<compile_context>
chip_gen: v6e
topology: v6e:2x2x1
jax: 0.10.0
libtpu: 0.0.40
codegen_flags: <defaults>
</compile_context>

<pallas_src>
import functools

import jax
import jax.numpy as jnp
from jax import lax
from jax.experimental import pallas as pl
from jax.experimental.pallas import tpu as pltpu

D_WINDOW = 3
SIGMA = D_WINDOW / 2.0                      # 1.5
INV_TWO_SIGMA_SQ = 1.0 / (2.0 * SIGMA * SIGMA)


def _refined_recip(x):
    """EUP approximate reciprocal + one Newton step (error ~2^-24, well under 1e-5)."""
    r = pl.reciprocal(x, approx=True)
    return r * (2.0 - x * r)


def _make_kernel(B, S, H, A):
    SB = S * B

    def kernel(h_t_ref, h_flat_ref, seq_ref, slab_ref, ctx_ref, alpha_ref):
        f32 = jnp.float32
        h_t = h_t_ref[...].astype(f32)        # (B, H)
        flat = h_flat_ref[...].astype(f32)    # (S*B, H); row i = h_enc[i // B, i % B, :]
        seq = seq_ref[...].astype(f32)        # (B, S)
        slab = slab_ref[...].astype(f32)      # (H, H+A+1) = [ w_a | w1 | w2 ]

        # ---- fused projection: one MXU pass gives both h_t @ W_a and h_t @ W1 ----
        proj = jnp.dot(h_t, slab, preferred_element_type=f32)     # (B, H+A+1)
        q = proj[:, :H]                                           # (B, H)
        hid = jnp.tanh(proj[:, H:H + A])                          # (B, A)

        # ---- p_t = L * sigmoid(w2 . tanh(W1 h_t)) ----
        logit = jnp.dot(hid, slab[:A, H + A:], preferred_element_type=f32)   # (B, 1)
        sig = _refined_recip(1.0 + jnp.exp(-logit))                          # (B, 1)
        length = jnp.sum((seq != 0.0).astype(f32), axis=-1, keepdims=True)   # (B, 1)
        pt = length * sig                                                    # (B, 1)

        # ---- selection masks built from 2-D iota (no vector integer div/mod) ----
        # sel[b, i] = (i % B == b): rows of `flat` that belong to batch b.
        # Gf[i, s]  = (i // B == s): sums each B-sized block back to sequence position s.
        bb = lax.broadcasted_iota(jnp.int32, (B, SB), 0)
        ii = lax.broadcasted_iota(jnp.int32, (B, SB), 1)
        if (B & (B - 1)) == 0:                      # power-of-two batch: bitwise, VPU-safe
            sel = (ii & (B - 1)) == bb
        else:                                       # generic fallback
            sel = lax.rem(ii, jnp.int32(B)) == bb
        gi = lax.broadcasted_iota(jnp.int32, (SB, S), 0)
        gs = lax.broadcasted_iota(jnp.int32, (SB, S), 1)
        Gf = ((gi >= gs * B) & (gi < gs * B + B)).astype(f32)     # (S*B, S)

        # ---- GlobalAttention scores on the MXU: q @ flat^T, block-diagonal extract ----
        scores_all = lax.dot_general(q, flat, (((1,), (1,)), ((), ())),
                                     preferred_element_type=f32)  # (B, S*B)
        scores = jnp.dot(jnp.where(sel, scores_all, 0.0), Gf,
                         preferred_element_type=f32)              # (B, S)

        # ---- softmax over S (EUP reciprocal) ----
        m = jnp.max(scores, axis=-1, keepdims=True)
        e = jnp.exp(scores - m)
        alphas = e * _refined_recip(jnp.sum(e, axis=-1, keepdims=True))      # (B, S)

        # ---- Gaussian window + re-weighted alphas ----
        coeff = jnp.exp(-((seq - pt) ** 2) * INV_TWO_SIGMA_SQ)               # (B, S)
        w = coeff * alphas
        alpha_ref[...] = w.astype(alpha_ref.dtype)

        # ---- context on the MXU: expand w to a block-diagonal (B, S*B) weight row ----
        w_exp = lax.dot_general(w, Gf, (((1,), (1,)), ((), ())),
                                preferred_element_type=f32)                  # (B, S*B)
        w_blk = jnp.where(sel, w_exp, 0.0)
        ctx_ref[...] = jnp.dot(w_blk, flat,
                               preferred_element_type=f32).astype(ctx_ref.dtype)

    return kernel


def pack_weights(w_a, w1, w2):
    """Pack w_a (H,H), w1 (H,A), w2 (A,1) into one (H, H+A+1) slab (done once at init)."""
    H = w_a.shape[0]
    A = w1.shape[1]
    assert w2.shape == (A, 1) and A <= H, "expects att_hidden_size <= hidden_size"
    slab = jnp.zeros((H, H + A + 1), jnp.float32)
    slab = slab.at[:, :H].set(w_a.astype(jnp.float32))
    slab = slab.at[:, H:H + A].set(w1.astype(jnp.float32))
    slab = slab.at[:A, H + A].set(w2[:, 0].astype(jnp.float32))
    return slab


@jax.jit
def local_attention(h_t, h_enc_sbh, seq_pos, w_slab):
    """h_t: (B, H); h_enc_sbh: (S, B, H) as in PyTorch; seq_pos: (B, S); w_slab packed."""
    B, H = h_t.shape
    S = h_enc_sbh.shape[0]
    A = w_slab.shape[1] - H - 1
    # (S,B,H) -> (S*B,H) is a pure row-major collapse: a free bitcast, NOT a transpose.
    h_flat = h_enc_sbh.reshape(S * B, H)

    vmem = pl.BlockSpec(memory_space=pltpu.MemorySpace.VMEM)
    ctx, alphas = pl.pallas_call(
        _make_kernel(B, S, H, A),
        out_shape=(jax.ShapeDtypeStruct((B, H), jnp.float32),
                   jax.ShapeDtypeStruct((B, S), jnp.float32)),
        in_specs=[vmem, vmem, vmem, vmem],
        out_specs=(vmem, vmem),
    )(h_t, h_flat, seq_pos, w_slab)

    return ctx[None], alphas                     # context: (1, B, H), alphas: (B, S)


def local_attention_reference(h_t, h_enc_sbh, seq_pos, w_a, w1, w2):
    """Pure-JAX reference mirroring the PyTorch forward."""
    h_enc = jnp.transpose(h_enc_sbh, (1, 0, 2))                   # (B, S, H)
    q = h_t @ w_a
    scores = jnp.einsum('bh,bsh->bs', q, h_enc)
    alphas = jax.nn.softmax(scores, axis=-1)
    p = jax.nn.sigmoid(jnp.tanh(h_t @ w1) @ w2)[:, 0]             # (B,)
    pt = jnp.sum(seq_pos != 0, axis=-1).astype(jnp.float32) * p   # (B,)
    coeff = jnp.exp(-((seq_pos - pt[:, None]) ** 2) / (2.0 * SIGMA ** 2))
    alphas = coeff * alphas
    context = jnp.sum(h_enc * alphas[..., None], axis=1)[None]
    return context, alphas


if __name__ == "__main__":
    B, S, H, A = 2, 8, 32, 32

    key = jax.random.PRNGKey(0)
    k_ht, k_enc, k_wa, k_w1, k_w2 = jax.random.split(key, 5)

    h_t = jax.random.normal(k_ht, (B, H), dtype=jnp.float32)
    h_enc = jax.random.normal(k_enc, (S, B, H), dtype=jnp.float32)   # PyTorch (S, B, H)

    # "sequence_lengths": per-batch position indices, 0 marks padding.
    seq_pos = jnp.array(
        [[1, 2, 3, 4, 5, 6, 7, 8],
         [1, 2, 3, 4, 5, 0, 0, 0]], dtype=jnp.float32)               # (B, S)

    # nn.Linear-style init: uniform(-1/sqrt(fan_in), 1/sqrt(fan_in)).
    bound = 1.0 / jnp.sqrt(H)
    w_a = jax.random.uniform(k_wa, (H, H), minval=-bound, maxval=bound, dtype=jnp.float32)
    w1 = jax.random.uniform(k_w1, (H, A), minval=-bound, maxval=bound, dtype=jnp.float32)
    bound_a = 1.0 / jnp.sqrt(A)
    w2 = jax.random.uniform(k_w2, (A, 1), minval=-bound_a, maxval=bound_a, dtype=jnp.float32)

    w_slab = pack_weights(w_a, w1, w2)           # packed once, like module init

    context, alphas = local_attention(h_t, h_enc, seq_pos, w_slab)
    jax.block_until_ready((context, alphas))

    ctx_ref, alphas_ref = local_attention_reference(h_t, h_enc, seq_pos, w_a, w1, w2)
    assert context.shape == (1, B, H) and alphas.shape == (B, S)
    assert jnp.allclose(context, ctx_ref, atol=1e-5, rtol=1e-5)
    assert jnp.allclose(alphas, alphas_ref, atol=1e-5, rtol=1e-5)

    print("KERNEL_OK")
</pallas_src>

<mosaic_0001>
module attributes {stable_mosaic.version = 11 : i64} {
  func.func @kernel(%arg0: memref<2x32xf32, #tpu.memory_space<vmem>>, %arg1: memref<16x32xf32, #tpu.memory_space<vmem>>, %arg2: memref<2x8xf32, #tpu.memory_space<vmem>>, %arg3: memref<32x65xf32, #tpu.memory_space<vmem>>, %arg4: memref<2x32xf32, #tpu.memory_space<vmem>>, %arg5: memref<2x8xf32, #tpu.memory_space<vmem>>) attributes {dimension_semantics = [], scalar_prefetch = 0 : i64, scratch_operands = 0 : i64, tpu.core_type = #tpu.core_type<tc>} {
    %c0 = arith.constant 0 : index
    %c0_0 = arith.constant 0 : index
    %0 = vector.load %arg0[%c0, %c0_0] : memref<2x32xf32, #tpu.memory_space<vmem>>, vector<2x32xf32>
    %c0_1 = arith.constant 0 : index
    %c0_2 = arith.constant 0 : index
    %1 = vector.load %arg1[%c0_1, %c0_2] : memref<16x32xf32, #tpu.memory_space<vmem>>, vector<16x32xf32>
    %c0_3 = arith.constant 0 : index
    %c0_4 = arith.constant 0 : index
    %2 = vector.load %arg2[%c0_3, %c0_4] : memref<2x8xf32, #tpu.memory_space<vmem>>, vector<2x8xf32>
    %c0_5 = arith.constant 0 : index
    %c0_6 = arith.constant 0 : index
    %3 = vector.load %arg3[%c0_5, %c0_6] : memref<32x65xf32, #tpu.memory_space<vmem>>, vector<32x65xf32>
    %cst = arith.constant dense<0.000000e+00> : vector<2x65xf32>
    %4 = tpu.matmul %0, %3, %cst {dimension_numbers = #tpu.dot_dimension_numbers<[1], [0], [0], [1], [0, 0, 1, 1], [], []>} : vector<2x32xf32>, vector<32x65xf32>, vector<2x65xf32> -> vector<2x65xf32>
    %5 = vector.extract_strided_slice %4 {offsets = [0, 0], sizes = [2, 32], strides = [1, 1]} : vector<2x65xf32> to vector<2x32xf32>
    %6 = vector.extract_strided_slice %4 {offsets = [0, 32], sizes = [2, 32], strides = [1, 1]} : vector<2x65xf32> to vector<2x32xf32>
    %7 = math.tanh %6 : vector<2x32xf32>
    %8 = vector.extract_strided_slice %3 {offsets = [0, 64], sizes = [32, 1], strides = [1, 1]} : vector<32x65xf32> to vector<32x1xf32>
    %cst_7 = arith.constant dense<0.000000e+00> : vector<2x1xf32>
    %9 = tpu.matmul %7, %8, %cst_7 {dimension_numbers = #tpu.dot_dimension_numbers<[1], [0], [0], [1], [0, 0, 1, 1], [], []>} : vector<2x32xf32>, vector<32x1xf32>, vector<2x1xf32> -> vector<2x1xf32>
    %cst_8 = arith.constant 0.000000e+00 : f32
    %10 = vector.broadcast %cst_8 : f32 to vector<2x1xf32>
    %11 = arith.subf %10, %9 : vector<2x1xf32>
    %12 = math.exp %11 : vector<2x1xf32>
    %cst_9 = arith.constant 1.000000e+00 : f32
    %13 = vector.broadcast %cst_9 : f32 to vector<2x1xf32>
    %14 = arith.addf %13, %12 : vector<2x1xf32>
    %15 = tpu.reciprocal %14 {approx = true} : vector<2x1xf32> -> vector<2x1xf32>
    %16 = arith.mulf %14, %15 : vector<2x1xf32>
    %cst_10 = arith.constant 2.000000e+00 : f32
    %17 = vector.broadcast %cst_10 : f32 to vector<2x1xf32>
    %18 = arith.subf %17, %16 : vector<2x1xf32>
    %19 = arith.mulf %15, %18 : vector<2x1xf32>
    %cst_11 = arith.constant 0.000000e+00 : f32
    %20 = vector.broadcast %cst_11 : f32 to vector<2x8xf32>
    %21 = arith.cmpf one, %2, %20 : vector<2x8xf32>
    %22 = arith.extui %21 : vector<2x8xi1> to vector<2x8xi32>
    %23 = arith.sitofp %22 : vector<2x8xi32> to vector<2x8xf32>
    %cst_12 = arith.constant dense<0.000000e+00> : vector<2xf32>
    %24 = vector.multi_reduction <add>, %23, %cst_12 [1] : vector<2x8xf32> to vector<2xf32>
    %25 = vector.shape_cast %24 : vector<2xf32> to vector<2x1xf32>
    %26 = arith.mulf %25, %19 : vector<2x1xf32>
    %27 = tpu.iota {dimensions = array<i32: 0>} : vector<2x16xi32>
    %28 = tpu.iota {dimensions = array<i32: 1>} : vector<2x16xi32>
    %c1_i32 = arith.constant 1 : i32
    %29 = vector.broadcast %c1_i32 : i32 to vector<2x16xi32>
    %30 = arith.andi %28, %29 : vector<2x16xi32>
    %31 = arith.cmpi eq, %30, %27 : vector<2x16xi32>
    %32 = tpu.iota {dimensions = array<i32: 0>} : vector<16x8xi32>
    %33 = tpu.iota {dimensions = array<i32: 1>} : vector<16x8xi32>
    %c2_i32 = arith.constant 2 : i32
    %34 = vector.broadcast %c2_i32 : i32 to vector<16x8xi32>
    %35 = arith.muli %33, %34 : vector<16x8xi32>
    %36 = arith.cmpi sge, %32, %35 : vector<16x8xi32>
    %c2_i32_13 = arith.constant 2 : i32
    %37 = vector.broadcast %c2_i32_13 : i32 to vector<16x8xi32>
    %38 = arith.muli %33, %37 : vector<16x8xi32>
    %c2_i32_14 = arith.constant 2 : i32
    %39 = vector.broadcast %c2_i32_14 : i32 to vector<16x8xi32>
    %40 = arith.addi %38, %39 : vector<16x8xi32>
    %41 = arith.cmpi slt, %32, %40 : vector<16x8xi32>
    %42 = arith.andi %36, %41 : vector<16x8xi1>
    %43 = arith.extui %42 : vector<16x8xi1> to vector<16x8xi32>
    %44 = arith.sitofp %43 : vector<16x8xi32> to vector<16x8xf32>
    %cst_15 = arith.constant dense<0.000000e+00> : vector<2x16xf32>
    %45 = tpu.matmul %5, %1, %cst_15 {dimension_numbers = #tpu.dot_dimension_numbers<[1], [1], [0], [0], [0, 0, 1, 0], [], []>} : vector<2x32xf32>, vector<16x32xf32>, vector<2x16xf32> -> vector<2x16xf32>
    %cst_16 = arith.constant 0.000000e+00 : f32
    %46 = vector.broadcast %cst_16 : f32 to vector<2x16xf32>
    %47 = arith.select %31, %45, %46 : vector<2x16xi1>, vector<2x16xf32>
    %cst_17 = arith.constant dense<0.000000e+00> : vector<2x8xf32>
    %48 = tpu.matmul %47, %44, %cst_17 {dimension_numbers = #tpu.dot_dimension_numbers<[1], [0], [0], [1], [0, 0, 1, 1], [], []>} : vector<2x16xf32>, vector<16x8xf32>, vector<2x8xf32> -> vector<2x8xf32>
    %cst_18 = arith.constant dense<0xFF800000> : vector<2xf32>
    %49 = vector.multi_reduction <maximumf>, %48, %cst_18 [1] : vector<2x8xf32> to vector<2xf32>
    %50 = vector.shape_cast %49 : vector<2xf32> to vector<2x1xf32>
    %51 = vector.broadcast %50 : vector<2x1xf32> to vector<2x8xf32>
    %52 = arith.subf %48, %51 : vector<2x8xf32>
    %53 = math.exp %52 : vector<2x8xf32>
    %cst_19 = arith.constant dense<0.000000e+00> : vector<2xf32>
    %54 = vector.multi_reduction <add>, %53, %cst_19 [1] : vector<2x8xf32> to vector<2xf32>
    %55 = vector.shape_cast %54 : vector<2xf32> to vector<2x1xf32>
    %56 = tpu.reciprocal %55 {approx = true} : vector<2x1xf32> -> vector<2x1xf32>
    %57 = arith.mulf %55, %56 : vector<2x1xf32>
    %cst_20 = arith.constant 2.000000e+00 : f32
    %58 = vector.broadcast %cst_20 : f32 to vector<2x1xf32>
    %59 = arith.subf %58, %57 : vector<2x1xf32>
    %60 = arith.mulf %56, %59 : vector<2x1xf32>
    %61 = vector.broadcast %60 : vector<2x1xf32> to vector<2x8xf32>
    %62 = arith.mulf %53, %61 : vector<2x8xf32>
    %63 = vector.broadcast %26 : vector<2x1xf32> to vector<2x8xf32>
    %64 = arith.subf %2, %63 : vector<2x8xf32>
    %65 = arith.mulf %64, %64 : vector<2x8xf32>
    %cst_21 = arith.constant 0.000000e+00 : f32
    %66 = vector.broadcast %cst_21 : f32 to vector<2x8xf32>
    %67 = arith.subf %66, %65 : vector<2x8xf32>
    %cst_22 = arith.constant 0.222222224 : f32
    %68 = vector.broadcast %cst_22 : f32 to vector<2x8xf32>
    %69 = arith.mulf %67, %68 : vector<2x8xf32>
    %70 = math.exp %69 : vector<2x8xf32>
    %71 = arith.mulf %70, %62 : vector<2x8xf32>
    %c0_23 = arith.constant 0 : index
    %c0_24 = arith.constant 0 : index
    %72 = vector.load %arg5[%c0_23, %c0_24] : memref<2x8xf32, #tpu.memory_space<vmem>>, vector<2x8xf32>
    tpu.vector_store %arg5[%c0_23, %c0_24], %71 {strides = array<i32>} : memref<2x8xf32, #tpu.memory_space<vmem>>, vector<2x8xf32>,
    %cst_25 = arith.constant dense<0.000000e+00> : vector<2x16xf32>
    %73 = tpu.matmul %71, %44, %cst_25 {dimension_numbers = #tpu.dot_dimension_numbers<[1], [1], [0], [0], [0, 0, 1, 0], [], []>} : vector<2x8xf32>, vector<16x8xf32>, vector<2x16xf32> -> vector<2x16xf32>
    %cst_26 = arith.constant 0.000000e+00 : f32
    %74 = vector.broadcast %cst_26 : f32 to vector<2x16xf32>
    %75 = arith.select %31, %73, %74 : vector<2x16xi1>, vector<2x16xf32>
    %cst_27 = arith.constant dense<0.000000e+00> : vector<2x32xf32>
    %76 = tpu.matmul %75, %1, %cst_27 {dimension_numbers = #tpu.dot_dimension_numbers<[1], [0], [0], [1], [0, 0, 1, 1], [], []>} : vector<2x16xf32>, vector<16x32xf32>, vector<2x32xf32> -> vector<2x32xf32>
    %c0_28 = arith.constant 0 : index
    %c0_29 = arith.constant 0 : index
    %77 = vector.load %arg4[%c0_28, %c0_29] : memref<2x32xf32, #tpu.memory_space<vmem>>, vector<2x32xf32>
    tpu.vector_store %arg4[%c0_28, %c0_29], %76 {strides = array<i32>} : memref<2x32xf32, #tpu.memory_space<vmem>>, vector<2x32xf32>,
    return
  }
}

</mosaic_0001>

<bundles_post_ra>
// kernel: local_attention.1
= control target key start
LH: loop header
LB: loop body
LE: loop exit
PB: predicated region body
PF: predicated region fallthrough
CT: control target
= control target key end

     0   :  { %11 = vsyncpa [#allocation3], 0  ;;  %s992_s0 = inlined_call_operand.hbm [shape: f32[2,32], index: 0, kind: input, shape index: {}]   ;;  %s993_s1 = inlined_call_operand.hbm [shape: f32[16,32], index: 1, kind: input, shape index: {}]   ;;  %s994_s2 = inlined_call_operand.vmem [shape: f32[2,8], index: 2, kind: input, shape index: {}]   ;;  %s995_s3 = inlined_call_operand.hbm [shape: f32[32,65], index: 3, kind: input, shape index: {}]   ;;  %s996_s4 = inlined_call_operand.hbm [shape: f32[2,32], index: 4, kind: output, shape index: {0}]   ;;  %s997_s5 = inlined_call_operand.hbm [shape: f32[2,8], index: 5, kind: output, shape index: {1}]  }
   0x1   :  { %12 = vsyncpa [#allocation6], 0 }
   0x2   :  { %13 = vsyncpa [#allocation4], 0 }
   0x3   :  { %14 = vsyncpa [#allocation10], 0  ;;  %s858_s18 = smov [#allocation5]  }
   0x4   :  { %s30_s19 = sshll.u32 %s858_s18, 4  ;;  %s31_s19 = int_to_ptr.vmem [resolvable:$true] %s30_s19 }
   0x5   :  { %s758_s20 = scalar_lea.vmem %s31_s19, 256  ;;  %p763_p1 = scmp.lt.s32.totalorder %s31_s19, %s31_s19 }
   0x6   :  { %p759_p0 = scmp.ne.s32.totalorder %s31_s19, %s758_s20  ;;  %p764_p2 = scmp.lt.s32.totalorder %s758_s20, %s758_s20 }
   0x8   :  { %p765_p3 = por %p764_p2, %p763_p1 }
   0xa   :  { %p766_p4 = pnand %p765_p3, %p759_p0 }
   0xc   :  { %769 = shalt.err (!%p766_p4)
}
   0xd   :  { %s859_s21 = smov 128   ;;  %s860_s22 = smov 8  }
   0xe   :  { %36 = dma.hbm_to_vmem [thread:$0]  %s993_s1, 256, %s31_s19, [#allocation6], %s859_s21, %s859_s21, %s860_s22  }
   0xf   :  { %s861_s25 = smov [#allocation2]   ;;  %s862_s27 = smov [#allocation7]  }
  0x10   :  { %s21_s26 = sshll.u32 %s861_s25, 4  ;;  %s44_s28 = sshll.u32 %s862_s27, 4  ;;  %s22_s26 = int_to_ptr.vmem [resolvable:$true] %s21_s26  ;;  %s45_s28 = int_to_ptr.vmem [resolvable:$true] %s44_s28 }
  0x11   :  { %s778_s29 = scalar_lea.vmem %s22_s26, 32  ;;  %p783_p6 = scmp.lt.s32.totalorder %s22_s26, %s22_s26 }
  0x12   :  { %p779_p5 = scmp.ne.s32.totalorder %s22_s26, %s778_s29  ;;  %p784_p7 = scmp.lt.s32.totalorder %s778_s29, %s778_s29 }
  0x14   :  { %p785_p8 = por %p784_p7, %p783_p6 }
  0x16   :  { %p786_p9 = pnand %p785_p8, %p779_p5 }
  0x18   :  { %789 = shalt.err (!%p786_p9)
}
  0x19   :  { %24 = dma.hbm_to_vmem [thread:$0]  %s992_s0, 32, %s22_s26, [#allocation3]  }
  0x1a   :  { %s798_s7 = scalar_lea.vmem %s45_s28, 512  ;;  %p803_p11 = scmp.lt.s32.totalorder %s45_s28, %s45_s28 }
  0x1b   :  { %p799_p10 = scmp.ne.s32.totalorder %s45_s28, %s798_s7  ;;  %p804_p12 = scmp.lt.s32.totalorder %s798_s7, %s798_s7 }
  0x1d   :  { %p805_p13 = por %p804_p12, %p803_p11 }
  0x1f   :  { %p806_p0 = pnand %p805_p13, %p799_p10 }
  0x21   :  { %809 = shalt.err (!%p806_p0)
}
  0x22   :  { %50 = dma.hbm_to_vmem [thread:$0]  %s995_s3, 512, %s45_s28, [#allocation6], %s859_s21, %s859_s21, %s860_s22  }
  0x23   :  { %850 = dma.done.wait [#allocation3], 32  }
  0x24   :  { %851 = vsyncadd [#allocation3], 4294967264 }
  0x25   :  { %852 = dma.done.wait [#allocation6], 768  }
  0x26   :  { %853 = vsyncadd [#allocation6], 4294966528  ;;  %v863_v0 = vmov 0.0   ;;  %vm864_vm0 = vmmov 0   ;;  %v67_v1 = vld [vmem:[#allocation7 + $0x18] sm:$0xff]  ;;  %v66_v2 = vld [vmem:[#allocation7 + $0x10] sm:$0xff]  ;;  %v250_v14 = vlaneseq }
  0x27   :  { %673 = vmatprep.subr.mxu0 %v863_v0  ;;  %681 = vmatprep.mubr.msk.f32.mxu0 %vm864_vm0, %v863_v0  ;;  %v65_v3 = vld [vmem:[#allocation7 + $0x8] sm:$0xff]  ;;  %v64_v4 = vld [vmem:[#allocation7] sm:$0xff]  ;;  %vm68_vm1 = vcmask 261120   ;;  %v62_v6 = vld [vmem:[#allocation5 + $0x8] sm:$0xff]  ;;  %s865_s0 = smov 64   ;;  %s866_s3 = smov 96  }
  0x28   :  { %684 = vmatprep.subr.mxu1 %v863_v0  ;;  %692 = vmatprep.mubr.msk.f32.mxu1 %vm864_vm0, %v863_v0  ;;  %v60_v5 = vld [vmem:[#allocation2] sm:$0x3]  ;;  %v61_v7 = vld [vmem:[#allocation5] sm:$0xff]  ;;  %v253_v15 = vand.u32 127, %v250_v14  ;;  %v251_v16 = vshrl.u32 %v250_v14, 7  ;;  %vm245_vm3 = vcmask 58368  }
  0x29   :  { %674 = vmatpush3.msra.mxu0 %v67_v1  ;;  %156 = vrot.lane.b32.xlu0 %v67_v1, %s865_s0  ;;  %v942_v20 = vld [vmem:[%s994_s2] sm:$0x3]  ;;  %v867_v29 = vmov 1.0   ;;  %vm349_vm11 = vcmask 130048   ;;  %v868_v33 = vmov 0   ;;  %vm450_vm12 = vcmask 64512  }
  0x2a   :  { %675 = vmatprep.subr.mxu0 %v863_v0  ;;  %152 = vrot.lane.b32.xlu1 %v65_v3, %s865_s0  ;;  %v254_v17 = vand.u32 1, %v253_v15  ;;  %vm242_vm4 = vcmp.ne.f32.partialorder %v942_v20, 0.0  ;;  %v257_v23 = vmul.u32 2, %v253_v15  ;;  %v256_v24 = vadd.s32 8, %v251_v16  ;;  %s869_s2 = smov [#allocation9]  }
  0x2b   :  { %676 = vmatpush3.msra.mxu0 %v66_v2  ;;  %v638_v21 = vsel %vm242_vm4, 1.0, %v863_v0  ;;  %736 = vset.pattern.permute.xlu1 %v868_v33  ;;  %s622_s11 = sshll.u32 %s869_s2, 4  ;;  %s623_s11 = int_to_ptr.vmem [resolvable:$true] %s622_s11 }
  0x2c   :  { %677 = vmatprep.subr.mxu0 %v863_v0  ;;  %vm935_vm2 = vcmp.eq.s32.totalorder %v254_v17, %v251_v16  ;;  %v246_v22 = vsel %vm245_vm3, %v638_v21, 0.0  ;;  %v260_v25 = vadd.s32 2, %v257_v23  ;;  %vm259_vm5 = vcmp.ge.s32.totalorder %v256_v24, %v257_v23  ;;  %737 = vset.pattern.permute.xlu0 %v868_v33  ;;  %s810_s12 = scalar_lea.vmem %s623_s11, 32  ;;  %p815_p2 = scmp.lt.s32.totalorder %s623_s11, %s623_s11 }
  0x2d   :  { %678 = vmatpush3.msra.mxu0 %v65_v3  ;;  %154 = vrot.lane.b32.xlu0 %v66_v2, %s865_s0  ;;  %vm258_vm7 = vcmp.ge.s32.totalorder %v251_v16, %v257_v23  ;;  %p811_p1 = scmp.ne.s32.totalorder %s623_s11, %s810_s12  ;;  %p816_p3 = scmp.lt.s32.totalorder %s810_s12, %s810_s12 }
  0x2e   :  { %679 = vmatprep.subr.mxu0 %v863_v0  ;;  %150 = vrot.lane.b32.xlu1 %v64_v4, %s865_s0  ;;  %vm262_vm6 = vcmp.lt.s32.totalorder %v256_v24, %v260_v25  ;;  %vm261_vm8 = vcmp.lt.s32.totalorder %v251_v16, %v260_v25 }
  0x2f   :  { %680 = vmatpush3.msra.mxu0 %v64_v4  ;;  %vm947_vm9 = vmand %vm259_vm5, %vm262_vm6  ;;  %p817_p4 = por %p816_p3, %p815_p2 }
  0x30   :  { %682 = vmatmul.mubr.msk.f32.vlgmr.msra.gmra.mxu0 %vm68_vm1, %v60_v5  ;;  %695 = vmatprep.subr.mxu0 %v863_v0  ;;  %vm952_vm10 = vmand %vm258_vm7, %vm261_vm8  ;;  %v640_v54 = vsel %vm947_vm9, 1.0, %v863_v0 }
  0x31   :  { %696 = vmatpush3.xpose.msk.msra.mxu0 %vm68_vm1, %v62_v6  ;;  %699 = vmatprep.mubr.msk.f32.mxu0 %vm864_vm0, %v863_v0  ;;  %v639_v55 = vsel %vm952_vm10, 1.0, %v863_v0  ;;  %p818_p5 = pnand %p817_p4, %p811_p1 }
  0x32   :  { %697 = vmatprep.subr.mxu0 %v863_v0 }
  0x35   :  { %698 = vmatpush3.xpose.msk.msra.mxu0 %vm68_vm1, %v61_v7 }
  0x36   :  { %716 = vmatprep.subr.mxu0 %v863_v0 }
  0x9b   :  { %v157_v8 = vpop.permute.xlu0 %156 }
  0x9c   :  { %v153_v9 = vpop.permute.xlu1 %152  ;;  %685 = vmatpush3.msra.mxu1 %v157_v8 }
  0x9d   :  { %686 = vmatprep.subr.mxu1 %v863_v0 }
  0x9f   :  { %v155_v10 = vpop.permute.xlu0 %154 }
  0xa0   :  { %687 = vmatpush3.msra.mxu1 %v155_v10  ;;  %v151_v11 = vpop.permute.xlu1 %150 }
  0xa1   :  { %688 = vmatprep.subr.mxu1 %v863_v0 }
  0xa2   :  { %689 = vmatpush3.msra.mxu1 %v153_v9 }
  0xa3   :  { %690 = vmatprep.subr.mxu1 %v863_v0 }
  0xa4   :  { %691 = vmatpush3.msra.mxu1 %v151_v11 }
  0xa5   :  { %702 = vmatprep.subr.mxu1 %v863_v0 }
  0xf0   :  { %v138_v12 = vpop.f32.mrf.mxu0 }
  0xf1   :  { %738 = vtanh.f32 %v138_v12  ;;  %700 = vmatmul.mubr.msk.f32.vlgmr.msra.gmra.mxu0 %vm68_vm1, %v138_v12 }
  0xf2   :  { %v683_v13 = vpop.f32.mrf.mxu0  ;;  %717 = vmatpush3.msra.mxu0 %v62_v6  ;;  %720 = vmatprep.mubr.msk.f32.mxu0 %vm864_vm0, %v863_v0 }
  0xf3   :  { %718 = vmatprep.subr.mxu0 %v863_v0 }
  0xf4   :  { %719 = vmatpush3.msra.mxu0 %v61_v7 }
  0xfe   :  { %v739_v19 = vpop.eup %738 }
  0xff   :  { %144 = vrot.lane.b32.xlu0 %v739_v19, %s866_s3 }
 0x11e   :  { %247 = vadd.xlane.f32.xlu0 %v246_v22 }
 0x171   :  { %v145_v27 = vpop.permute.xlu0 %144 }
 0x172   :  { %693 = vmatmul.mubr.msk.f32.vlgmr.msra.gmra.mxu1 %vm68_vm1, %v145_v27 }
 0x173   :  { %703 = vmatpush3.msk.msra.mxu1 %vm947_vm9, %v867_v29  ;;  %706 = vmatprep.mubr.msk.f32.mxu1 %vm864_vm0, %v863_v0 }
 0x174   :  { %704 = vmatprep.subr.mxu1 %v863_v0 }
 0x175   :  { %705 = vmatpush3.msk.msra.mxu1 %vm952_vm10, %v867_v29 }
 0x176   :  { %709 = vmatprep.subr.mxu1 %v863_v0 }
 0x1a7   :  { %v248_v47 = vpop.xlane.xlu0 %247 }
 0x1b1   :  { %v344_v30 = vpop.f32.mrf.mxu0 }
 0x1b2   :  { %v348_v31 = vsel %vm935_vm2, %v344_v30, 0.0 }
 0x1b3   :  { %v701_v32 = vpop.f32.mrf.mxu0  ;;  %707 = vmatmul.mubr.msk.f32.vlgmr.msra.gmra.mxu1 %vm349_vm11, %v348_v31 }
 0x1b4   :  { %713 = vmatprep.mubr.msk.f32.mxu1 %vm864_vm0, %v863_v0  ;;  %710 = vmatpush3.xpose.msk.msra.mxu1 %vm450_vm12, %v640_v54 }
 0x1b5   :  { %711 = vmatprep.subr.mxu1 %v863_v0 }
 0x1b8   :  { %712 = vmatpush3.xpose.msk.msra.mxu1 %vm450_vm12, %v639_v55 }
 0x232   :  { %v230_v34 = vpop.f32.mrf.mxu1 }
 0x233   :  { %v234_v36 = vsub.f32 0.0, %v230_v34 }
 0x234   :  { %v694_v35 = vpop.f32.mrf.mxu1 }
 0x235   :  { %v235_v37 = vmul.f32 1.442695, %v234_v36 }
 0x237   :  { %740 = vpow2.f32 %v235_v37 }
 0x244   :  { %v741_v38 = vpop.eup %740 }
 0x245   :  { %v237_v39 = vadd.f32 1.0, %v741_v38 }
 0x247   :  { %742 = vrcp.f32 %v237_v39 }
 0x254   :  { %v743_v42 = vpop.eup %742 }
 0x255   :  { %v239_v44 = vmul.f32 %v743_v42, %v237_v39 }
 0x257   :  { %v240_v45 = vsub.f32 2.0, %v239_v44 }
 0x259   :  { %v241_v46 = vmul.f32 %v743_v42, %v240_v45 }
 0x25b   :  { %v249_v48 = vmul.f32 %v248_v47, %v241_v46 }
 0x273   :  { %v419_v40 = vpop.f32.mrf.mxu1 }
 0x274   :  { %v423_v41 = vsel %vm245_vm3, %v419_v40, -inf }
 0x275   :  { %424 = vmax.xlane.f32.xlu1 %v423_v41  ;;  %v708_v43 = vpop.f32.mrf.mxu1 }
 0x286   :  { %439 = vperm.xlu1 %736, %v249_v48  }
 0x2fe   :  { %v425_v49 = vpop.xlane.xlu1 %424 }
 0x2ff   :  { %v426_v50 = vsub.f32 %v419_v40, %v425_v49 }
 0x301   :  { %v427_v51 = vmul.f32 1.442695, %v426_v50 }
 0x302   :  { %v440_v56 = vpop.permute.xlu1 %439 }
 0x303   :  { %744 = vpow2.f32 %v427_v51  ;;  %v442_v57 = vsub.f32 %v942_v20, %v440_v56 }
 0x305   :  { %v443_v58 = vmul.f32 %v442_v57, %v442_v57 }
 0x307   :  { %v444_v59 = vsub.f32 0.0, %v443_v58 }
 0x309   :  { %v445_v61 = vmul.f32 0.22222222, %v444_v59 }
 0x30b   :  { %v446_v62 = vmul.f32 1.442695, %v445_v61 }
 0x310   :  { %v745_v52 = vpop.eup %744 }
 0x311   :  { %v429_v53 = vsel %vm245_vm3, %v745_v52, 0.0 }
 0x312   :  { %430 = vadd.xlane.f32.xlu0 %v429_v53 }
 0x39b   :  { %v431_v60 = vpop.xlane.xlu0 %430 }
 0x39c   :  { %746 = vrcp.f32 %v431_v60 }
 0x39d   :  { %748 = vpow2.f32 %v446_v62 }
 0x3a9   :  { %v747_v63 = vpop.eup %746 }
 0x3aa   :  { %v433_v1 = vmul.f32 %v747_v63, %v431_v60  ;;  %v749_v5 = vpop.eup %748 }
 0x3ac   :  { %v434_v2 = vsub.f32 2.0, %v433_v1 }
 0x3ae   :  { %v435_v3 = vmul.f32 %v747_v63, %v434_v2 }
 0x3b0   :  { %v436_v4 = vmul.f32 %v745_v52, %v435_v3 }
 0x3b2   :  { %v448_v6 = vmul.f32 %v749_v5, %v436_v4 }
 0x3b4   :  { %449 = vst.msk [vmem:[#allocation9] sm:$0x3] %vm245_vm3, %v448_v6  ;;  %714 = vmatmul.mubr.msk.f32.vlgmr.msra.gmra.mxu1 %vm450_vm12, %v448_v6 }
 0x474   :  { %v526_v0 = vpop.f32.mrf.mxu1 }
 0x475   :  { %v530_v7 = vsel %vm935_vm2, %v526_v0, 0.0 }
 0x476   :  { %v715_v8 = vpop.f32.mrf.mxu1  ;;  %721 = vmatmul.mubr.msk.f32.vlgmr.msra.gmra.mxu0 %vm349_vm11, %v530_v7 }
 0x477   :  { %821 = shalt.err (!%p818_p5)
}
 0x478   :  { %625 = dma.vmem_to_hbm [thread:$0]  %s623_s11, 32, %s997_s5, [#allocation10]   ;;  %vm604_vm13 = vcmask 254976  }
 0x479   :  { %s870_s15 = smov [#allocation8]  }
 0x47a   :  { %s612_s16 = sshll.u32 %s870_s15, 4  ;;  %s613_s16 = int_to_ptr.vmem [resolvable:$true] %s612_s16 }
 0x47b   :  { %s830_s17 = scalar_lea.vmem %s613_s16, 32  ;;  %p835_p7 = scmp.lt.s32.totalorder %s613_s16, %s613_s16 }
 0x47c   :  { %p831_p6 = scmp.ne.s32.totalorder %s613_s16, %s830_s17  ;;  %p836_p8 = scmp.lt.s32.totalorder %s830_s17, %s830_s17 }
 0x47e   :  { %p837_p9 = por %p836_p8, %p835_p7 }
 0x480   :  { %p838_p10 = pnand %p837_p9, %p831_p6 }
 0x536   :  { %v600_v9 = vpop.f32.mrf.mxu0 }
 0x537   :  { %605 = vst.msk [vmem:[#allocation8] sm:$0x3] %vm604_vm13, %v600_v9 }
 0x538   :  { %v722_v10 = vpop.f32.mrf.mxu0 }
 0x539   :  { %841 = shalt.err (!%p838_p10)
}
 0x53a   :  { %615 = dma.vmem_to_hbm [thread:$0]  %s613_s16, 32, %s996_s4, [#allocation4]  }
 0x53b   :  { %854 = dma.done.wait [#allocation4], 32  }
 0x53c   :  { %855 = vsyncadd [#allocation4], 4294967264 }
 0x53d   :  { %856 = dma.done.wait [#allocation10], 32  }
 0x53e   :  { %857 = vsyncadd [#allocation10], 4294967264 }
 0x53f   :  { %632 = vsyncpa [#allocation3], 1 }
 0x540   :  { %633 = vsyncpa [#allocation6], 1 }
 0x541   :  { %634 = vsyncpa [#allocation4], 1 }
 0x542   :  { %635 = vsyncpa [#allocation10], 1 }

</bundles_post_ra>
